<compile_context>
chip_gen: v5e
topology: v5e:2x2
jax: 0.10.0
libtpu: 0.0.40
codegen_flags: <defaults>
</compile_context>

<pallas_src>
import functools

import jax
import jax.numpy as jnp
from jax import lax
from jax.experimental import pallas as pl
from jax.experimental.pallas import tpu as pltpu  # noqa: F401  (TPU backend assumed)


# ----------------------------------------------------------------------------
# Shared in-kernel helper: RK4 integration of the ODEGCN vector field
#   f(t, y) = relu( adj @ ( cat([t*1, GroupNorm(y)], 1) @ W ) + b )
# The time channel is handled algebraically: cat([t, xn]) @ W = t*W[0] + xn@W[1:].
# GroupNorm(min(32,H), H) per row: mean/var over channels of each group,
# reduced AND broadcast back in one matmul with the (H,H) same-group indicator.
# ----------------------------------------------------------------------------
def _rk4_ode_integrate(y, adj_bf, wx_bf, wt, bo, gamma, beta, gsum_mat,
                       *, num_steps, group_size, eps):
    f32 = jnp.float32
    bf16 = jnp.bfloat16
    inv_gs = 1.0 / group_size

    def groupnorm(v):
        # mean/var are already broadcast per-channel by the indicator matmul.
        mean = jnp.dot(v, gsum_mat, preferred_element_type=f32) * inv_gs
        d = v - mean                                             # two-pass
        var = jnp.dot(d * d, gsum_mat, preferred_element_type=f32) * inv_gs
        return d * lax.rsqrt(var + eps) * gamma + beta

    def odefunc(t, v):
        xn = groupnorm(v)
        sup = jnp.dot(xn.astype(bf16), wx_bf, preferred_element_type=f32)
        sup = sup + t * wt
        o = jnp.dot(adj_bf, sup.astype(bf16), preferred_element_type=f32) + bo
        return jnp.maximum(o, 0.0)

    dt = 1.0 / num_steps

    def rk4_step(i, v):
        # 4 stage evaluations statically unrolled; outer loop stays rolled.
        t0 = i.astype(f32) * dt
        k1 = odefunc(t0, v)
        k2 = odefunc(t0 + 0.5 * dt, v + (0.5 * dt) * k1)
        k3 = odefunc(t0 + 0.5 * dt, v + (0.5 * dt) * k2)
        k4 = odefunc(t0 + dt, v + dt * k3)
        return v + (dt / 6.0) * (k1 + 2.0 * k2 + 2.0 * k3 + k4)

    return lax.fori_loop(0, num_steps, rk4_step, y)


# ----------------------------------------------------------------------------
# Kernel A: ODEBlock.forward(x, adj)  — exactly the spec module (fused RK4)
# ----------------------------------------------------------------------------
def _ode_block_kernel(adj_ref, x_ref, gamma_ref, beta_ref, gsum_ref,
                      wt_ref, wx_ref, bo_ref, out_ref,
                      *, num_steps, group_size, eps):
    adj_bf = adj_ref[...].astype(jnp.bfloat16)
    y = _rk4_ode_integrate(
        x_ref[...], adj_bf, wx_ref[...].astype(jnp.bfloat16),
        wt_ref[...], bo_ref[...], gamma_ref[...], beta_ref[...], gsum_ref[...],
        num_steps=num_steps, group_size=group_size, eps=eps)
    out_ref[...] = y.astype(out_ref.dtype)


def ode_block(x, adj, p, num_steps=8):
    """ODEBlock.forward: integrate dx/dt = odefunc(t, x) from t=0 to t=1."""
    n, h = x.shape
    kernel = functools.partial(_ode_block_kernel, num_steps=num_steps,
                               group_size=p["group_size"], eps=1e-5)
    return pl.pallas_call(
        kernel,
        out_shape=jax.ShapeDtypeStruct((n, h), jnp.float32),
    )(adj.astype(jnp.float32), x.astype(jnp.float32),
      p["gamma"], p["beta"], p["gsum_mat"], p["wt"], p["wx"], p["b"])


# ----------------------------------------------------------------------------
# Kernel B: fully fused network forward
#   gc1(relu) -> ODEBlock (RK4) -> gc3 -> log_softmax(dim=1)
# ----------------------------------------------------------------------------
def _odegcn3_kernel(adj_ref, x_ref, w1_ref, b1_ref,
                    gamma_ref, beta_ref, gsum_ref, wt_ref, wx_ref, bo_ref,
                    w3_ref, b3_ref, out_ref,
                    *, num_steps, group_size, eps):
    f32, bf16 = jnp.float32, jnp.bfloat16
    adj_bf = adj_ref[...].astype(bf16)

    # gc1: y = relu(adj @ (x @ W1) + b1)
    s1 = jnp.dot(x_ref[...].astype(bf16), w1_ref[...].astype(bf16),
                 preferred_element_type=f32)
    y = jnp.maximum(
        jnp.dot(adj_bf, s1.astype(bf16), preferred_element_type=f32)
        + b1_ref[...], 0.0)

    # ODE block (state stays resident on-chip; no HBM round-trips).
    y = _rk4_ode_integrate(
        y, adj_bf, wx_ref[...].astype(bf16),
        wt_ref[...], bo_ref[...], gamma_ref[...], beta_ref[...], gsum_ref[...],
        num_steps=num_steps, group_size=group_size, eps=eps)

    # gc3: z = adj @ (y @ W3) + b3
    s3 = jnp.dot(y.astype(bf16), w3_ref[...].astype(bf16),
                 preferred_element_type=f32)
    z = jnp.dot(adj_bf, s3.astype(bf16), preferred_element_type=f32) + b3_ref[...]

    # log_softmax over dim=1
    m = jnp.max(z, axis=1, keepdims=True)
    s = z - m
    lse = jnp.log(jnp.sum(jnp.exp(s), axis=1, keepdims=True))
    out_ref[...] = (s - lse).astype(out_ref.dtype)


def odegcn3_forward(x, adj, params, num_steps=8):
    n = x.shape[0]
    nclass = params["gc3_w"].shape[1]
    p = params["ode"]
    kernel = functools.partial(_odegcn3_kernel, num_steps=num_steps,
                               group_size=p["group_size"], eps=1e-5)
    # No grid / BlockSpecs on purpose: whole arrays live in VMEM (tiny working
    # set), one dispatch for the entire forward pass.
    return pl.pallas_call(
        kernel,
        out_shape=jax.ShapeDtypeStruct((n, nclass), jnp.float32),
    )(adj.astype(jnp.float32), x.astype(jnp.float32),
      params["gc1_w"], params["gc1_b"],
      p["gamma"], p["beta"], p["gsum_mat"], p["wt"], p["wx"], p["b"],
      params["gc3_w"], params["gc3_b"])


# ----------------------------------------------------------------------------
# Deterministic parameter init (pygcn-style uniform(-stdv, stdv), stdv=1/sqrt(out))
# All reshapes / dtype prep hoisted here (done once, not per call).
# ----------------------------------------------------------------------------
def init_params(key, nfeat, nhid, nclass):
    def gcn_init(k, fin, fout):
        stdv = 1.0 / jnp.sqrt(jnp.float32(fout))
        kw, kb = jax.random.split(k)
        w = jax.random.uniform(kw, (fin, fout), jnp.float32, -stdv, stdv)
        b = jax.random.uniform(kb, (fout,), jnp.float32, -stdv, stdv)
        return w, b

    k1, k2, k3 = jax.random.split(key, 3)
    gc1_w, gc1_b = gcn_init(k1, nfeat, nhid)
    gc3_w, gc3_b = gcn_init(k3, nhid, nclass)

    # ODEfunc: GroupNorm(min(32, nhid), nhid) + FixedGraphConvolution(nhid+1, nhid)
    num_groups = min(32, nhid)
    assert nhid % num_groups == 0
    group_size = nhid // num_groups
    group_ids = jnp.arange(nhid) // group_size                       # (H,)
    # (H, H) same-group indicator: one matmul both reduces over the group and
    # broadcasts the statistic back per channel.
    gsum_mat = (group_ids[:, None] == group_ids[None, :]).astype(jnp.float32)

    ode_w, ode_b = gcn_init(k2, nhid + 1, nhid)
    ode = dict(
        gamma=jnp.ones((1, nhid), jnp.float32),
        beta=jnp.zeros((1, nhid), jnp.float32),
        gsum_mat=gsum_mat,                       # (H, H)
        wt=ode_w[0].reshape(1, nhid),            # time-channel row of W
        wx=ode_w[1:],                            # (H, H) feature rows of W
        b=ode_b.reshape(1, nhid),
        group_size=float(group_size),
    )
    return dict(gc1_w=gc1_w, gc1_b=gc1_b.reshape(1, nhid),
                gc3_w=gc3_w, gc3_b=gc3_b.reshape(1, nclass), ode=ode)


if __name__ == "__main__":
    key = jax.random.PRNGKey(0)
    N, NFEAT, NHID, NCLASS = 16, 32, 64, 8

    kx, ka, kp, kh = jax.random.split(key, 4)
    x = jax.random.normal(kx, (N, NFEAT), jnp.float32)

    # Symmetric, row-normalized dense adjacency (self-loops included).
    a = (jax.random.uniform(ka, (N, N)) > 0.7).astype(jnp.float32)
    a = jnp.maximum(a, a.T) + jnp.eye(N, dtype=jnp.float32)
    adj = a / jnp.sum(a, axis=1, keepdims=True)

    params = init_params(kp, NFEAT, NHID, NCLASS)

    # Standalone ODEBlock (the spec module): x has the hidden width.
    h0 = jax.random.normal(kh, (N, NHID), jnp.float32)
    ode_out = jax.block_until_ready(ode_block(h0, adj, params["ode"]))
    assert ode_out.shape == (N, NHID)
    assert bool(jnp.all(jnp.isfinite(ode_out)))

    # Fully fused network forward (single pallas_call).
    out = jax.block_until_ready(odegcn3_forward(x, adj, params))
    assert out.shape == (N, NCLASS)
    assert bool(jnp.all(jnp.isfinite(out)))
    print("KERNEL_OK")
</pallas_src>

<mosaic_0001>
module attributes {stable_mosaic.version = 11 : i64} {
  func.func @_ode_block_kernel(%arg0: memref<16x16xf32, #tpu.memory_space<vmem>>, %arg1: memref<16x64xf32, #tpu.memory_space<vmem>>, %arg2: memref<1x64xf32, #tpu.memory_space<vmem>>, %arg3: memref<1x64xf32, #tpu.memory_space<vmem>>, %arg4: memref<64x64xf32, #tpu.memory_space<vmem>>, %arg5: memref<1x64xf32, #tpu.memory_space<vmem>>, %arg6: memref<64x64xf32, #tpu.memory_space<vmem>>, %arg7: memref<1x64xf32, #tpu.memory_space<vmem>>, %arg8: memref<16x64xf32, #tpu.memory_space<vmem>>) attributes {dimension_semantics = [], scalar_prefetch = 0 : i64, scratch_operands = 0 : i64, tpu.core_type = #tpu.core_type<tc>} {
    %c0 = arith.constant 0 : index
    %c0_0 = arith.constant 0 : index
    %0 = vector.load %arg0[%c0, %c0_0] : memref<16x16xf32, #tpu.memory_space<vmem>>, vector<16x16xf32>
    %1 = arith.truncf %0 : vector<16x16xf32> to vector<16x16xbf16>
    %c0_1 = arith.constant 0 : index
    %c0_2 = arith.constant 0 : index
    %2 = vector.load %arg1[%c0_1, %c0_2] : memref<16x64xf32, #tpu.memory_space<vmem>>, vector<16x64xf32>
    %c0_3 = arith.constant 0 : index
    %c0_4 = arith.constant 0 : index
    %3 = vector.load %arg6[%c0_3, %c0_4] : memref<64x64xf32, #tpu.memory_space<vmem>>, vector<64x64xf32>
    %4 = arith.truncf %3 : vector<64x64xf32> to vector<64x64xbf16>
    %c0_5 = arith.constant 0 : index
    %c0_6 = arith.constant 0 : index
    %5 = vector.load %arg5[%c0_5, %c0_6] : memref<1x64xf32, #tpu.memory_space<vmem>>, vector<1x64xf32>
    %c0_7 = arith.constant 0 : index
    %c0_8 = arith.constant 0 : index
    %6 = vector.load %arg7[%c0_7, %c0_8] : memref<1x64xf32, #tpu.memory_space<vmem>>, vector<1x64xf32>
    %c0_9 = arith.constant 0 : index
    %c0_10 = arith.constant 0 : index
    %7 = vector.load %arg2[%c0_9, %c0_10] : memref<1x64xf32, #tpu.memory_space<vmem>>, vector<1x64xf32>
    %c0_11 = arith.constant 0 : index
    %c0_12 = arith.constant 0 : index
    %8 = vector.load %arg3[%c0_11, %c0_12] : memref<1x64xf32, #tpu.memory_space<vmem>>, vector<1x64xf32>
    %c0_13 = arith.constant 0 : index
    %c0_14 = arith.constant 0 : index
    %9 = vector.load %arg4[%c0_13, %c0_14] : memref<64x64xf32, #tpu.memory_space<vmem>>, vector<64x64xf32>
    %c0_i32 = arith.constant 0 : i32
    %c8_i32 = arith.constant 8 : i32
    %10 = arith.addi %c0_i32, %c8_i32 : i32
    %c1_i32 = arith.constant 1 : i32
    %11 = scf.for %arg9 = %c0_i32 to %10 step %c1_i32 iter_args(%arg10 = %2) -> (vector<16x64xf32>)  : i32 {
      %13 = arith.sitofp %arg9 : i32 to f32
      %cst = arith.constant 1.250000e-01 : f32
      %14 = arith.mulf %13, %cst : f32
      %cst_18 = arith.constant dense<0.000000e+00> : vector<16x64xf32>
      %15 = tpu.matmul %arg10, %9, %cst_18 {dimension_numbers = #tpu.dot_dimension_numbers<[1], [0], [0], [1], [0, 0, 1, 1], [], []>} : vector<16x64xf32>, vector<64x64xf32>, vector<16x64xf32> -> vector<16x64xf32>
      %cst_19 = arith.constant 5.000000e-01 : f32
      %16 = vector.broadcast %cst_19 : f32 to vector<16x64xf32>
      %17 = arith.mulf %15, %16 : vector<16x64xf32>
      %18 = arith.subf %arg10, %17 : vector<16x64xf32>
      %19 = arith.mulf %18, %18 : vector<16x64xf32>
      %cst_20 = arith.constant dense<0.000000e+00> : vector<16x64xf32>
      %20 = tpu.matmul %19, %9, %cst_20 {dimension_numbers = #tpu.dot_dimension_numbers<[1], [0], [0], [1], [0, 0, 1, 1], [], []>} : vector<16x64xf32>, vector<64x64xf32>, vector<16x64xf32> -> vector<16x64xf32>
      %cst_21 = arith.constant 5.000000e-01 : f32
      %21 = vector.broadcast %cst_21 : f32 to vector<16x64xf32>
      %22 = arith.mulf %20, %21 : vector<16x64xf32>
      %cst_22 = arith.constant 9.99999974E-6 : f32
      %23 = vector.broadcast %cst_22 : f32 to vector<16x64xf32>
      %24 = arith.addf %22, %23 : vector<16x64xf32>
      %25 = math.rsqrt %24 : vector<16x64xf32>
      %26 = arith.mulf %18, %25 : vector<16x64xf32>
      %27 = vector.broadcast %7 : vector<1x64xf32> to vector<16x64xf32>
      %28 = arith.mulf %26, %27 : vector<16x64xf32>
      %29 = vector.broadcast %8 : vector<1x64xf32> to vector<16x64xf32>
      %30 = arith.addf %28, %29 : vector<16x64xf32>
      %31 = arith.truncf %30 : vector<16x64xf32> to vector<16x64xbf16>
      %cst_23 = arith.constant dense<0.000000e+00> : vector<16x64xf32>
      %32 = tpu.matmul %31, %4, %cst_23 {dimension_numbers = #tpu.dot_dimension_numbers<[1], [0], [0], [1], [0, 0, 1, 1], [], []>} : vector<16x64xbf16>, vector<64x64xbf16>, vector<16x64xf32> -> vector<16x64xf32>
      %33 = vector.broadcast %14 : f32 to vector<1x64xf32>
      %34 = arith.mulf %33, %5 : vector<1x64xf32>
      %35 = vector.broadcast %34 : vector<1x64xf32> to vector<16x64xf32>
      %36 = arith.addf %32, %35 : vector<16x64xf32>
      %37 = arith.truncf %36 : vector<16x64xf32> to vector<16x64xbf16>
      %cst_24 = arith.constant dense<0.000000e+00> : vector<16x64xf32>
      %38 = tpu.matmul %1, %37, %cst_24 {dimension_numbers = #tpu.dot_dimension_numbers<[1], [0], [0], [1], [0, 0, 1, 1], [], []>} : vector<16x16xbf16>, vector<16x64xbf16>, vector<16x64xf32> -> vector<16x64xf32>
      %39 = vector.broadcast %6 : vector<1x64xf32> to vector<16x64xf32>
      %40 = arith.addf %38, %39 : vector<16x64xf32>
      %cst_25 = arith.constant 0.000000e+00 : f32
      %41 = vector.broadcast %cst_25 : f32 to vector<16x64xf32>
      %42 = arith.maximumf %40, %41 : vector<16x64xf32>
      %cst_26 = arith.constant 6.250000e-02 : f32
      %43 = arith.addf %14, %cst_26 : f32
      %cst_27 = arith.constant 6.250000e-02 : f32
      %44 = vector.broadcast %cst_27 : f32 to vector<16x64xf32>
      %45 = arith.mulf %44, %42 : vector<16x64xf32>
      %46 = arith.addf %arg10, %45 : vector<16x64xf32>
      %cst_28 = arith.constant dense<0.000000e+00> : vector<16x64xf32>
      %47 = tpu.matmul %46, %9, %cst_28 {dimension_numbers = #tpu.dot_dimension_numbers<[1], [0], [0], [1], [0, 0, 1, 1], [], []>} : vector<16x64xf32>, vector<64x64xf32>, vector<16x64xf32> -> vector<16x64xf32>
      %cst_29 = arith.constant 5.000000e-01 : f32
      %48 = vector.broadcast %cst_29 : f32 to vector<16x64xf32>
      %49 = arith.mulf %47, %48 : vector<16x64xf32>
      %50 = arith.subf %46, %49 : vector<16x64xf32>
      %51 = arith.mulf %50, %50 : vector<16x64xf32>
      %cst_30 = arith.constant dense<0.000000e+00> : vector<16x64xf32>
      %52 = tpu.matmul %51, %9, %cst_30 {dimension_numbers = #tpu.dot_dimension_numbers<[1], [0], [0], [1], [0, 0, 1, 1], [], []>} : vector<16x64xf32>, vector<64x64xf32>, vector<16x64xf32> -> vector<16x64xf32>
      %cst_31 = arith.constant 5.000000e-01 : f32
      %53 = vector.broadcast %cst_31 : f32 to vector<16x64xf32>
      %54 = arith.mulf %52, %53 : vector<16x64xf32>
      %cst_32 = arith.constant 9.99999974E-6 : f32
      %55 = vector.broadcast %cst_32 : f32 to vector<16x64xf32>
      %56 = arith.addf %54, %55 : vector<16x64xf32>
      %57 = math.rsqrt %56 : vector<16x64xf32>
      %58 = arith.mulf %50, %57 : vector<16x64xf32>
      %59 = vector.broadcast %7 : vector<1x64xf32> to vector<16x64xf32>
      %60 = arith.mulf %58, %59 : vector<16x64xf32>
      %61 = vector.broadcast %8 : vector<1x64xf32> to vector<16x64xf32>
      %62 = arith.addf %60, %61 : vector<16x64xf32>
      %63 = arith.truncf %62 : vector<16x64xf32> to vector<16x64xbf16>
      %cst_33 = arith.constant dense<0.000000e+00> : vector<16x64xf32>
      %64 = tpu.matmul %63, %4, %cst_33 {dimension_numbers = #tpu.dot_dimension_numbers<[1], [0], [0], [1], [0, 0, 1, 1], [], []>} : vector<16x64xbf16>, vector<64x64xbf16>, vector<16x64xf32> -> vector<16x64xf32>
      %65 = vector.broadcast %43 : f32 to vector<1x64xf32>
      %66 = arith.mulf %65, %5 : vector<1x64xf32>
      %67 = vector.broadcast %66 : vector<1x64xf32> to vector<16x64xf32>
      %68 = arith.addf %64, %67 : vector<16x64xf32>
      %69 = arith.truncf %68 : vector<16x64xf32> to vector<16x64xbf16>
      %cst_34 = arith.constant dense<0.000000e+00> : vector<16x64xf32>
      %70 = tpu.matmul %1, %69, %cst_34 {dimension_numbers = #tpu.dot_dimension_numbers<[1], [0], [0], [1], [0, 0, 1, 1], [], []>} : vector<16x16xbf16>, vector<16x64xbf16>, vector<16x64xf32> -> vector<16x64xf32>
      %71 = vector.broadcast %6 : vector<1x64xf32> to vector<16x64xf32>
      %72 = arith.addf %70, %71 : vector<16x64xf32>
      %cst_35 = arith.constant 0.000000e+00 : f32
      %73 = vector.broadcast %cst_35 : f32 to vector<16x64xf32>
      %74 = arith.maximumf %72, %73 : vector<16x64xf32>
      %cst_36 = arith.constant 6.250000e-02 : f32
      %75 = arith.addf %14, %cst_36 : f32
      %cst_37 = arith.constant 6.250000e-02 : f32
      %76 = vector.broadcast %cst_37 : f32 to vector<16x64xf32>
      %77 = arith.mulf %76, %74 : vector<16x64xf32>
      %78 = arith.addf %arg10, %77 : vector<16x64xf32>
      %cst_38 = arith.constant dense<0.000000e+00> : vector<16x64xf32>
      %79 = tpu.matmul %78, %9, %cst_38 {dimension_numbers = #tpu.dot_dimension_numbers<[1], [0], [0], [1], [0, 0, 1, 1], [], []>} : vector<16x64xf32>, vector<64x64xf32>, vector<16x64xf32> -> vector<16x64xf32>
      %cst_39 = arith.constant 5.000000e-01 : f32
      %80 = vector.broadcast %cst_39 : f32 to vector<16x64xf32>
      %81 = arith.mulf %79, %80 : vector<16x64xf32>
      %82 = arith.subf %78, %81 : vector<16x64xf32>
      %83 = arith.mulf %82, %82 : vector<16x64xf32>
      %cst_40 = arith.constant dense<0.000000e+00> : vector<16x64xf32>
      %84 = tpu.matmul %83, %9, %cst_40 {dimension_numbers = #tpu.dot_dimension_numbers<[1], [0], [0], [1], [0, 0, 1, 1], [], []>} : vector<16x64xf32>, vector<64x64xf32>, vector<16x64xf32> -> vector<16x64xf32>
      %cst_41 = arith.constant 5.000000e-01 : f32
      %85 = vector.broadcast %cst_41 : f32 to vector<16x64xf32>
      %86 = arith.mulf %84, %85 : vector<16x64xf32>
      %cst_42 = arith.constant 9.99999974E-6 : f32
      %87 = vector.broadcast %cst_42 : f32 to vector<16x64xf32>
      %88 = arith.addf %86, %87 : vector<16x64xf32>
      %89 = math.rsqrt %88 : vector<16x64xf32>
      %90 = arith.mulf %82, %89 : vector<16x64xf32>
      %91 = vector.broadcast %7 : vector<1x64xf32> to vector<16x64xf32>
      %92 = arith.mulf %90, %91 : vector<16x64xf32>
      %93 = vector.broadcast %8 : vector<1x64xf32> to vector<16x64xf32>
      %94 = arith.addf %92, %93 : vector<16x64xf32>
      %95 = arith.truncf %94 : vector<16x64xf32> to vector<16x64xbf16>
      %cst_43 = arith.constant dense<0.000000e+00> : vector<16x64xf32>
      %96 = tpu.matmul %95, %4, %cst_43 {dimension_numbers = #tpu.dot_dimension_numbers<[1], [0], [0], [1], [0, 0, 1, 1], [], []>} : vector<16x64xbf16>, vector<64x64xbf16>, vector<16x64xf32> -> vector<16x64xf32>
      %97 = vector.broadcast %75 : f32 to vector<1x64xf32>
      %98 = arith.mulf %97, %5 : vector<1x64xf32>
      %99 = vector.broadcast %98 : vector<1x64xf32> to vector<16x64xf32>
      %100 = arith.addf %96, %99 : vector<16x64xf32>
      %101 = arith.truncf %100 : vector<16x64xf32> to vector<16x64xbf16>
      %cst_44 = arith.constant dense<0.000000e+00> : vector<16x64xf32>
      %102 = tpu.matmul %1, %101, %cst_44 {dimension_numbers = #tpu.dot_dimension_numbers<[1], [0], [0], [1], [0, 0, 1, 1], [], []>} : vector<16x16xbf16>, vector<16x64xbf16>, vector<16x64xf32> -> vector<16x64xf32>
      %103 = vector.broadcast %6 : vector<1x64xf32> to vector<16x64xf32>
      %104 = arith.addf %102, %103 : vector<16x64xf32>
      %cst_45 = arith.constant 0.000000e+00 : f32
      %105 = vector.broadcast %cst_45 : f32 to vector<16x64xf32>
      %106 = arith.maximumf %104, %105 : vector<16x64xf32>
      %cst_46 = arith.constant 1.250000e-01 : f32
      %107 = arith.addf %14, %cst_46 : f32
      %cst_47 = arith.constant 1.250000e-01 : f32
      %108 = vector.broadcast %cst_47 : f32 to vector<16x64xf32>
      %109 = arith.mulf %108, %106 : vector<16x64xf32>
      %110 = arith.addf %arg10, %109 : vector<16x64xf32>
      %cst_48 = arith.constant dense<0.000000e+00> : vector<16x64xf32>
      %111 = tpu.matmul %110, %9, %cst_48 {dimension_numbers = #tpu.dot_dimension_numbers<[1], [0], [0], [1], [0, 0, 1, 1], [], []>} : vector<16x64xf32>, vector<64x64xf32>, vector<16x64xf32> -> vector<16x64xf32>
      %cst_49 = arith.constant 5.000000e-01 : f32
      %112 = vector.broadcast %cst_49 : f32 to vector<16x64xf32>
      %113 = arith.mulf %111, %112 : vector<16x64xf32>
      %114 = arith.subf %110, %113 : vector<16x64xf32>
      %115 = arith.mulf %114, %114 : vector<16x64xf32>
      %cst_50 = arith.constant dense<0.000000e+00> : vector<16x64xf32>
      %116 = tpu.matmul %115, %9, %cst_50 {dimension_numbers = #tpu.dot_dimension_numbers<[1], [0], [0], [1], [0, 0, 1, 1], [], []>} : vector<16x64xf32>, vector<64x64xf32>, vector<16x64xf32> -> vector<16x64xf32>
      %cst_51 = arith.constant 5.000000e-01 : f32
      %117 = vector.broadcast %cst_51 : f32 to vector<16x64xf32>
      %118 = arith.mulf %116, %117 : vector<16x64xf32>
      %cst_52 = arith.constant 9.99999974E-6 : f32
      %119 = vector.broadcast %cst_52 : f32 to vector<16x64xf32>
      %120 = arith.addf %118, %119 : vector<16x64xf32>
      %121 = math.rsqrt %120 : vector<16x64xf32>
      %122 = arith.mulf %114, %121 : vector<16x64xf32>
      %123 = vector.broadcast %7 : vector<1x64xf32> to vector<16x64xf32>
      %124 = arith.mulf %122, %123 : vector<16x64xf32>
      %125 = vector.broadcast %8 : vector<1x64xf32> to vector<16x64xf32>
      %126 = arith.addf %124, %125 : vector<16x64xf32>
      %127 = arith.truncf %126 : vector<16x64xf32> to vector<16x64xbf16>
      %cst_53 = arith.constant dense<0.000000e+00> : vector<16x64xf32>
      %128 = tpu.matmul %127, %4, %cst_53 {dimension_numbers = #tpu.dot_dimension_numbers<[1], [0], [0], [1], [0, 0, 1, 1], [], []>} : vector<16x64xbf16>, vector<64x64xbf16>, vector<16x64xf32> -> vector<16x64xf32>
      %129 = vector.broadcast %107 : f32 to vector<1x64xf32>
      %130 = arith.mulf %129, %5 : vector<1x64xf32>
      %131 = vector.broadcast %130 : vector<1x64xf32> to vector<16x64xf32>
      %132 = arith.addf %128, %131 : vector<16x64xf32>
      %133 = arith.truncf %132 : vector<16x64xf32> to vector<16x64xbf16>
      %cst_54 = arith.constant dense<0.000000e+00> : vector<16x64xf32>
      %134 = tpu.matmul %1, %133, %cst_54 {dimension_numbers = #tpu.dot_dimension_numbers<[1], [0], [0], [1], [0, 0, 1, 1], [], []>} : vector<16x16xbf16>, vector<16x64xbf16>, vector<16x64xf32> -> vector<16x64xf32>
      %135 = vector.broadcast %6 : vector<1x64xf32> to vector<16x64xf32>
      %136 = arith.addf %134, %135 : vector<16x64xf32>
      %cst_55 = arith.constant 0.000000e+00 : f32
      %137 = vector.broadcast %cst_55 : f32 to vector<16x64xf32>
      %138 = arith.maximumf %136, %137 : vector<16x64xf32>
      %cst_56 = arith.constant 2.000000e+00 : f32
      %139 = vector.broadcast %cst_56 : f32 to vector<16x64xf32>
      %140 = arith.mulf %139, %74 : vector<16x64xf32>
      %141 = arith.addf %42, %140 : vector<16x64xf32>
      %cst_57 = arith.constant 2.000000e+00 : f32
      %142 = vector.broadcast %cst_57 : f32 to vector<16x64xf32>
      %143 = arith.mulf %142, %106 : vector<16x64xf32>
      %144 = arith.addf %141, %143 : vector<16x64xf32>
      %145 = arith.addf %144, %138 : vector<16x64xf32>
      %cst_58 = arith.constant 0.020833334 : f32
      %146 = vector.broadcast %cst_58 : f32 to vector<16x64xf32>
      %147 = arith.mulf %146, %145 : vector<16x64xf32>
      %148 = arith.addf %arg10, %147 : vector<16x64xf32>
      scf.yield %148 : vector<16x64xf32>
    }
    %c8_i32_15 = arith.constant 8 : i32
    %c0_16 = arith.constant 0 : index
    %c0_17 = arith.constant 0 : index
    %12 = vector.load %arg8[%c0_16, %c0_17] : memref<16x64xf32, #tpu.memory_space<vmem>>, vector<16x64xf32>
    tpu.vector_store %arg8[%c0_16, %c0_17], %11 {strides = array<i32>} : memref<16x64xf32, #tpu.memory_space<vmem>>, vector<16x64xf32>,
    return
  }
}

</mosaic_0001>

<bundles_post_ra>
// kernel: tpu_custom_call.1
= control target key start
LH: loop header
LB: loop body
LE: loop exit
PB: predicated region body
PF: predicated region fallthrough
CT: control target
= control target key end

     0   :  { %13 = vsyncpa [#allocation3], 0  ;;  %s1334_s0 = inlined_call_operand.hbm [shape: f32[16,16], index: 0, kind: input, shape index: {}]   ;;  %s1335_s1 = inlined_call_operand.hbm [shape: f32[16,64], index: 1, kind: input, shape index: {}]   ;;  %s1336_s2 = inlined_call_operand.vmem [shape: f32[1,64], index: 2, kind: input, shape index: {}]   ;;  %s1337_s3 = inlined_call_operand.vmem [shape: f32[1,64], index: 3, kind: input, shape index: {}]   ;;  %s1338_s4 = inlined_call_operand.hbm [shape: f32[64,64], index: 4, kind: input, shape index: {}]   ;;  %s1339_s5 = inlined_call_operand.vmem [shape: f32[1,64], index: 5, kind: input, shape index: {}]   ;;  %s1340_s6 = inlined_call_operand.hbm [shape: f32[64,64], index: 6, kind: input, shape index: {}]   ;;  %s1341_s7 = inlined_call_operand.vmem [shape: f32[1,64], index: 7, kind: input, shape index: {}]   ;;  %s1342_s8 = inlined_call_operand.hbm [shape: f32[16,64], index: 8, kind: output, shape index: {}]  }
   0x1   :  { %14 = vsyncpa [#allocation6], 0 }
   0x2   :  { %15 = vsyncpa [#allocation9], 0 }
   0x3   :  { %16 = vsyncpa [#allocation4], 0  ;;  %s34_s29 = sshll.u32 %s1335_s1, 4  ;;  %s972_s30 = smov [#allocation5]   ;;  %s35_s29 = int_to_ptr.hbm [resolvable:$true] %s34_s29 }
   0x4   :  { %s36_s9 = sshll.u32 %s972_s30, 4  ;;  %s21_s12 = sshll.u32 %s1334_s0, 4  ;;  %s37_s9 = int_to_ptr.vmem [resolvable:$true] %s36_s9  ;;  %s22_s12 = int_to_ptr.hbm [resolvable:$true] %s21_s12 }
   0x5   :  { %s973_s13 = smov 128   ;;  %s974_s14 = smov 8  }
   0x6   :  { %42 = dma.hbm_to_vmem [thread:$0]  %s35_s29, 256, %s37_s9, [#allocation6], %s973_s13, %s973_s13, %s974_s14  }
   0x7   :  { %s975_s15 = smov [#allocation2]   ;;  %s51_s1 = sshll.u32 %s1338_s4, 4  ;;  %s52_s1 = int_to_ptr.hbm [resolvable:$true] %s51_s1 }
   0x8   :  { %s23_s16 = sshll.u32 %s975_s15, 4  ;;  %s66_s20 = sshll.u32 %s1340_s6, 4  ;;  %s24_s16 = int_to_ptr.vmem [resolvable:$true] %s23_s16  ;;  %s67_s20 = int_to_ptr.hbm [resolvable:$true] %s66_s20 }
   0x9   :  { %29 = dma.hbm_to_vmem [thread:$0]  %s22_s12, 256, %s24_s16, [#allocation3], %s973_s13, %s973_s13, %s974_s14  }
   0xa   :  { %s976_s21 = smov [#allocation7]   ;;  %s977_s23 = smov [#allocation8]  }
   0xb   :  { %s53_s22 = sshll.u32 %s976_s21, 4  ;;  %s68_s4 = sshll.u32 %s977_s23, 4  ;;  %s54_s22 = int_to_ptr.vmem [resolvable:$true] %s53_s22  ;;  %s69_s4 = int_to_ptr.vmem [resolvable:$true] %s68_s4 }
   0xc   :  { %59 = dma.hbm_to_vmem [thread:$0]  %s52_s1, 1024, %s54_s22, [#allocation6], %s973_s13, %s973_s13, %s974_s14  }
   0xd   :  { %74 = dma.hbm_to_vmem [thread:$0]  %s67_s20, 1024, %s69_s4, [#allocation9], %s973_s13, %s973_s13, %s974_s14  }
   0xe   :  { %952 = dma.done.wait [#allocation3], 256  }
   0xf   :  { %953 = vsyncadd [#allocation3], 4294967040 }
  0x10   :  { %954 = dma.done.wait [#allocation6], 1280  }
  0x11   :  { %955 = vsyncadd [#allocation6], 4294966016 }
  0x12   :  { %956 = dma.done.wait [#allocation9], 1024  }
  0x13   :  { %957 = vsyncadd [#allocation9], 4294966272  ;;  %v94_v0 = vld [vmem:[#allocation2] sm:$0xff]  ;;  %v95_v1 = vld [vmem:[#allocation2 + $0x8] sm:$0xff] }
  0x14   :  { %v97_v2 = vld [vmem:[#allocation5] sm:$0xff]   ;;  %v1048_v3 = vpack.c.bf16 %v95_v1, %v94_v0  ;;  %v98_v4 = vld [vmem:[#allocation5 + $0x8] sm:$0xff]   ;;  %v99_v5 = vld [vmem:[#allocation8] sm:$0xff] }
  0x15   :  { %v100_v6 = vld [vmem:[#allocation8 + $0x8] sm:$0xff]  ;;  %v101_v7 = vld [vmem:[#allocation8 + $0x10] sm:$0xff]  ;;  %v102_v8 = vld [vmem:[#allocation8 + $0x18] sm:$0xff] }
  0x16   :  { %v103_v9 = vld [vmem:[#allocation8 + $0x20] sm:$0xff]  ;;  %v1050_v10 = vpack.c.bf16 %v100_v6, %v99_v5  ;;  %v104_v11 = vld [vmem:[#allocation8 + $0x28] sm:$0xff]  ;;  %v105_v12 = vld [vmem:[#allocation8 + $0x30] sm:$0xff]  ;;  %v1052_v14 = vpack.c.bf16 %v102_v8, %v101_v7 }
  0x17   :  { %v106_v13 = vld [vmem:[#allocation8 + $0x38] sm:$0xff]  ;;  %v1054_v15 = vpack.c.bf16 %v104_v11, %v103_v9  ;;  %v1061_v17 = vld [vmem:[%s1339_s5] sm:$0x1]  ;;  %v1080_v22 = vld [vmem:[#allocation7 + $0x8] sm:$0xff] }
  0x18   :  { %v1056_v16 = vpack.c.bf16 %v106_v13, %v105_v12  ;;  %v1066_v18 = vld [vmem:[%s1341_s7] sm:$0x1]  ;;  %v1082_v23 = vld [vmem:[#allocation7 + $0x10] sm:$0xff]  ;;  %v1084_v24 = vld [vmem:[#allocation7 + $0x18] sm:$0xff] }
  0x19   :  { %v1071_v19 = vld [vmem:[%s1336_s2] sm:$0x1]  ;;  %v1088_v26 = vld [vmem:[#allocation7 + $0x28] sm:$0xff]  ;;  %v1090_v27 = vld [vmem:[#allocation7 + $0x30] sm:$0xff]  ;;  %s1098_s2 = smov 0  }
  0x1a   :  { %v1076_v20 = vld [vmem:[%s1337_s3] sm:$0x1]  ;;  %v1092_v28 = vld [vmem:[#allocation7 + $0x38] sm:$0xff] }
  0x1b   :  { %v1078_v21 = vld [vmem:[#allocation7] sm:$0xff] }
  0x1c   :  { %v1086_v25 = vld [vmem:[#allocation7 + $0x20] sm:$0xff] }
  0x1d LB: > { %148 = vmatpush.msra.mxu0 %v1092_v28  ;;  %183 = vmatpush.msra.mxu1 %v1092_v28  ;;  %vm133_vm0 = vcmask 523264   ;;  %v1162_v56 = vperm.slane %v1071_v19, 0  ;;  %v1166_v61 = vperm.slane %v1076_v20, 0  ;;  %s131_s3 = scvt.s32.f32 %s970_s2  ;;  %vm261_vm7 = vcmask 130048   ;;  %s128_s2 = sadd.s32 1, %s970_s2   ;;  %s970_s2 = sphi %s1098_s2, %s128_s2   ;;  %v966_v2 = vphi %v97_v2, %v1344_v2   ;;  %v962_v4 = vphi %v98_v4, %v1343_v4  }
  0x1e   : > { %247 = vmatpush.bf16.msra.mxu2 %v1056_v16  ;;  %p125_p0 = scmp.ge.s32.totalorder %s128_s2, 8  }
  0x1f   : > { %149 = vmatpush.msra.mxu0 %v1090_v27  ;;  %184 = vmatpush.msra.mxu1 %v1090_v27  ;;  %s1173_s5 = smul.f32 0.125, %s131_s3  ;;  %s715_s12 = sshll.u32 (%p125_p0), %s1342_s8, 4  ;;  %s716_s12 = int_to_ptr.hbm [resolvable:$true] %s715_s12 }
  0x20   :  { %s978_s15 = smov (%p125_p0), [#allocation10]  }
  0x21   : > { %150 = vmatpush.msra.mxu0 %v1088_v26  ;;  %185 = vmatpush.msra.mxu1 %v1088_v26  ;;  %v235_v5 = vstv %s1173_s5  ;;  %s281_s7 = sadd.f32 0.0625, %s1173_s5  ;;  %s713_s16 = sshll.u32 (%p125_p0), %s978_s15, 4  ;;  %s714_s16 = int_to_ptr.vmem [resolvable:$true] %s713_s16 }
  0x22   : > { %248 = vmatpush.bf16.msra.mxu2 %v1054_v15  ;;  %v236_v7 = vmul.f32 %v235_v5, %v1061_v17  ;;  %s553_s9 = sadd.f32 0.125, %s1173_s5 }
  0x23   : > { %151 = vmatpush.msra.mxu0 %v1086_v25  ;;  %186 = vmatpush.msra.mxu1 %v1086_v25 }
  0x24   : > { %v238_v8 = vperm.slane %v236_v7, 0 }
  0x25   : > { %152 = vmatpush.msra.mxu0 %v1084_v24  ;;  %187 = vmatpush.msra.mxu1 %v1084_v24 }
  0x26   : > { %249 = vmatpush.bf16.msra.mxu2 %v1052_v14 }
  0x27   : > { %153 = vmatpush.msra.mxu0 %v1082_v23  ;;  %188 = vmatpush.msra.mxu1 %v1082_v23 }
  0x29   : > { %154 = vmatpush.msra.mxu0 %v1080_v22  ;;  %189 = vmatpush.msra.mxu1 %v1080_v22 }
  0x2a   : > { %250 = vmatpush.bf16.msra.mxu2 %v1050_v10 }
  0x2b   : > { %155 = vmatpush.msra.mxu0 %v1078_v21  ;;  %190 = vmatpush.msra.mxu1 %v1078_v21 }
  0x2c   : > { %741 = vmatmul.msk.f32.vlgmr.msra.gmra.mxu0 %vm133_vm0, %v966_v2 }
  0x2d   : > { %393 = vmatpush.bf16.msrb.mxu1 %v1056_v16  ;;  %335 = vmatpush.msrb.mxu0 %v1092_v28 }
  0x2f   : > { %336 = vmatpush.msrb.mxu0 %v1090_v27 }
  0x31   : > { %394 = vmatpush.bf16.msrb.mxu1 %v1054_v15  ;;  %337 = vmatpush.msrb.mxu0 %v1088_v26 }
  0x33   : > { %338 = vmatpush.msrb.mxu0 %v1086_v25 }
  0x34   : > { %742 = vmatmul.msk.f32.gmra.mxu0 %vm133_vm0, %v962_v4 }
  0x35   : > { %395 = vmatpush.bf16.msrb.mxu1 %v1052_v14  ;;  %339 = vmatpush.msrb.mxu0 %v1084_v24 }
  0x37   : > { %340 = vmatpush.msrb.mxu0 %v1082_v23 }
  0x39   : > { %396 = vmatpush.bf16.msrb.mxu1 %v1050_v10  ;;  %341 = vmatpush.msrb.mxu0 %v1080_v22 }
  0x3b   : > { %342 = vmatpush.msrb.mxu0 %v1078_v21 }
  0x3d   : > { %473 = vmatpush.msra.mxu0 %v1092_v28 }
  0x3f   : > { %474 = vmatpush.msra.mxu0 %v1090_v27 }
  0x41   : > { %475 = vmatpush.msra.mxu0 %v1088_v26 }
  0x43   : > { %476 = vmatpush.msra.mxu0 %v1086_v25 }
  0x45   : > { %477 = vmatpush.msra.mxu0 %v1084_v24 }
  0x47   : > { %478 = vmatpush.msra.mxu0 %v1082_v23 }
  0x49   : > { %479 = vmatpush.msra.mxu0 %v1080_v22 }
  0x4b   : > { %480 = vmatpush.msra.mxu0 %v1078_v21 }
  0xa9   : > { %v157_v29 = vpop.f32.mrf.mxu0 }
  0xaa   : > { %v163_v30 = vmul.f32 0.5, %v157_v29  ;;  %v1196_v29 = vperm.slane %v1066_v18, 0 }
  0xac   : > { %v165_v31 = vsub.f32 %v966_v2, %v163_v30 }
  0xae   : > { %v167_v32 = vmul.f32 %v165_v31, %v165_v31 }
  0xb0   : > { %743 = vmatmul.msk.f32.vlgmr.msra.gmra.mxu1 %vm133_vm0, %v167_v32 }
  0xb1   : > { %v160_v33 = vpop.f32.mrf.mxu0  ;;  %526 = vmatpush.bf16.msra.mxu1 %v1056_v16 }
  0xb2   : > { %v164_v34 = vmul.f32 0.5, %v160_v33 }
  0xb4   : > { %v166_v35 = vsub.f32 %v962_v4, %v164_v34 }
  0xb5   : > { %527 = vmatpush.bf16.msra.mxu1 %v1054_v15 }
  0xb6   : > { %v168_v36 = vmul.f32 %v166_v35, %v166_v35 }
  0xb8   : > { %744 = vmatmul.msk.f32.gmra.mxu1 %vm133_vm0, %v168_v36 }
  0xb9   : > { %528 = vmatpush.bf16.msra.mxu1 %v1052_v14 }
  0xbd   : > { %529 = vmatpush.bf16.msra.mxu1 %v1050_v10 }
 0x12d   : > { %v192_v37 = vpop.f32.mrf.mxu1 }
 0x12e   : > { %v198_v38 = vmul.f32 0.5, %v192_v37 }
 0x130   : > { %v200_v39 = vadd.f32 1e-05, %v198_v38 }
 0x132   : > { %804 = vrsqrt.f32 %v200_v39  ;;  %vm208_vm2 = vweird.f32 %v200_v39 }
 0x135   : > { %v195_v40 = vpop.f32.mrf.mxu1 }
 0x136   : > { %v199_v41 = vmul.f32 0.5, %v195_v40 }
 0x138   : > { %v805_v42 = vpop.eup %804  ;;  %v201_v43 = vadd.f32 1e-05, %v199_v41 }
 0x139   : > { %v203_v44 = vmul.f32 %v805_v42, %v200_v39  ;;  %vm209_vm1 = vweird.f32 %v805_v42 }
 0x13a   : > { %806 = vrsqrt.f32 %v201_v43  ;;  %vm210_vm3 = vmor %vm208_vm2, %vm209_vm1  ;;  %vm218_vm5 = vweird.f32 %v201_v43 }
 0x13b   : > { %v204_v45 = vmul.f32 %v805_v42, %v203_v44 }
 0x13d   : > { %v205_v46 = vmul.f32 0.5, %v204_v45 }
 0x13f   : > { %v206_v47 = vsub.f32 1.5, %v205_v46 }
 0x140   : > { %v807_v48 = vpop.eup %806 }
 0x141   : > { %v207_v49 = vmul.f32 %v805_v42, %v206_v47  ;;  %v213_v50 = vmul.f32 %v807_v48, %v201_v43  ;;  %vm219_vm4 = vweird.f32 %v807_v48 }
 0x142   : > { %vm220_vm6 = vmor %vm218_vm5, %vm219_vm4 }
 0x143   : > { %v214_v51 = vmul.f32 %v807_v48, %v213_v50  ;;  %v211_v52 = vsel %vm210_vm3, %v805_v42, %v207_v49 }
 0x144   : > { %v222_v55 = vmul.f32 %v211_v52, %v165_v31 }
 0x145   : > { %v215_v53 = vmul.f32 0.5, %v214_v51 }
 0x146   : > { %v227_v60 = vmul.f32 %v1162_v56, %v222_v55 }
 0x147   : > { %v216_v54 = vsub.f32 1.5, %v215_v53 }
 0x148   : > { %v232_v63 = vadd.f32 %v1166_v61, %v227_v60 }
 0x149   : > { %v217_v57 = vmul.f32 %v807_v48, %v216_v54 }
 0x14b   : > { %v221_v58 = vsel %vm220_vm6, %v807_v48, %v217_v57 }
 0x14c   : > { %v223_v59 = vmul.f32 %v221_v58, %v166_v35 }
 0x14e   : > { %v228_v62 = vmul.f32 %v1162_v56, %v223_v59 }
 0x150   : > { %v233_v0 = vadd.f32 %v1166_v61, %v228_v62 }
 0x152   : > { %v234_v1 = vpack.c.bf16 %v233_v0, %v232_v63 }
 0x154   : > { %745 = vmatmul.msk.bf16.vlgmr.msra.gmra.mxu2 %vm133_vm0, %v234_v1 }
 0x1d7   : > { %v252_v6 = vpop.f32.mrf.mxu2 }
 0x1d8   : > { %v253_v11 = vadd.f32 %v252_v6, %v238_v8 }
 0x1df   : > { %v254_v9 = vpop.f32.mrf.mxu2 }
 0x1e0   : > { %v255_v12 = vadd.f32 %v254_v9, %v238_v8 }
 0x1e2   : > { %v257_v13 = vpack.c.bf16 %v255_v12, %v253_v11 }
 0x1e4   : > { %272 = vmatpush.bf16.msra.mxu3 %v257_v13 }
 0x1e7   : > { %746 = vmatmul.msk.bf16.vlgmr.msra.gmra.mxu3 %vm261_vm7, %v1048_v3 }
 0x1e8   : > { %300 = vmatpush.msrb.mxu3 %v1092_v28 }
 0x1ea   : > { %301 = vmatpush.msrb.mxu3 %v1090_v27 }
 0x1ec   : > { %302 = vmatpush.msrb.mxu3 %v1088_v26 }
 0x1ee   : > { %303 = vmatpush.msrb.mxu3 %v1086_v25 }
 0x1f0   : > { %304 = vmatpush.msrb.mxu3 %v1084_v24 }
 0x1f2   : > { %305 = vmatpush.msrb.mxu3 %v1082_v23 }
 0x1f4   : > { %306 = vmatpush.msrb.mxu3 %v1080_v22 }
 0x1f6   : > { %307 = vmatpush.msrb.mxu3 %v1078_v21 }
 0x1f8   : > { %438 = vmatpush.msra.mxu3 %v1092_v28 }
 0x1fa   : > { %439 = vmatpush.msra.mxu3 %v1090_v27 }
 0x1fc   : > { %440 = vmatpush.msra.mxu3 %v1088_v26 }
 0x1fe   : > { %441 = vmatpush.msra.mxu3 %v1086_v25 }
 0x200   : > { %442 = vmatpush.msra.mxu3 %v1084_v24 }
 0x202   : > { %443 = vmatpush.msra.mxu3 %v1082_v23 }
 0x204   : > { %444 = vmatpush.msra.mxu3 %v1080_v22 }
 0x206   : > { %445 = vmatpush.msra.mxu3 %v1078_v21 }
 0x26a   : > { %v274_v30 = vpop.f32.mrf.mxu3 }
 0x26b   : > { %v1199_v31 = vadd.f32 %v274_v30, %v1196_v29 }
 0x26d   : > { %v279_v32 = vmax.f32 %v1199_v31, 0.0 }
 0x26f   : > { %v282_v33 = vmul.f32 0.0625, %v279_v32 }
 0x271   : > { %v284_v34 = vadd.f32 %v966_v2, %v282_v33 }
 0x272   : > { %v276_v35 = vpop.f32.mrf.mxu3 }
 0x273   : > { %v1206_v36 = vadd.f32 %v276_v35, %v1196_v29  ;;  %747 = vmatmul.msk.f32.vlgmr.msrb.gmra.mxu3 %vm133_vm0, %v284_v34  ;;  %v381_v35 = vstv %s281_s7 }
 0x274   : > { %572 = vmatpush.msrb.mxu3 %v1092_v28 }
 0x275   : > { %v280_v37 = vmax.f32 %v1206_v36, 0.0 }
 0x276   : > { %573 = vmatpush.msrb.mxu3 %v1090_v27 }
 0x277   : > { %v283_v38 = vmul.f32 0.0625, %v280_v37 }
 0x278   : > { %574 = vmatpush.msrb.mxu3 %v1088_v26 }
 0x279   : > { %v285_v39 = vadd.f32 %v962_v4, %v283_v38 }
 0x27a   : > { %575 = vmatpush.msrb.mxu3 %v1086_v25 }
 0x27b   : > { %748 = vmatmul.msk.f32.gmra.mxu3 %vm133_vm0, %v285_v39 }
 0x27c   : > { %576 = vmatpush.msrb.mxu3 %v1084_v24 }
 0x27e   : > { %577 = vmatpush.msrb.mxu3 %v1082_v23 }
 0x280   : > { %578 = vmatpush.msrb.mxu3 %v1080_v22 }
 0x282   : > { %579 = vmatpush.msrb.mxu3 %v1078_v21 }
 0x2f6   : > { %v309_v40 = vpop.f32.mrf.mxu3 }
 0x2f7   : > { %v315_v41 = vmul.f32 0.5, %v309_v40 }
 0x2f9   : > { %v317_v42 = vsub.f32 %v284_v34, %v315_v41 }
 0x2fb   : > { %v319_v43 = vmul.f32 %v317_v42, %v317_v42 }
 0x2fd   : > { %749 = vmatmul.msk.f32.vlgmr.msrb.gmra.mxu0 %vm133_vm0, %v319_v43 }
 0x2fe   : > { %v312_v44 = vpop.f32.mrf.mxu3  ;;  %607 = vmatpush.msrb.mxu0 %v1092_v28 }
 0x2ff   : > { %v316_v45 = vmul.f32 0.5, %v312_v44 }
 0x300   : > { %608 = vmatpush.msrb.mxu0 %v1090_v27 }
 0x301   : > { %v318_v46 = vsub.f32 %v285_v39, %v316_v45  ;;  %v382_v39 = vmul.f32 %v381_v35, %v1061_v17 }
 0x302   : > { %609 = vmatpush.msrb.mxu0 %v1088_v26 }
 0x303   : > { %v320_v47 = vmul.f32 %v318_v46, %v318_v46  ;;  %v1243_v40 = vperm.slane %v382_v39, 0 }
 0x304   : > { %610 = vmatpush.msrb.mxu0 %v1086_v25 }
 0x305   : > { %750 = vmatmul.msk.f32.gmra.mxu0 %vm133_vm0, %v320_v47 }
 0x306   : > { %611 = vmatpush.msrb.mxu0 %v1084_v24 }
 0x308   : > { %612 = vmatpush.msrb.mxu0 %v1082_v23 }
 0x30a   : > { %613 = vmatpush.msrb.mxu0 %v1080_v22 }
 0x30c   : > { %614 = vmatpush.msrb.mxu0 %v1078_v21 }
 0x37a   : > { %v344_v48 = vpop.f32.mrf.mxu0 }
 0x37b   : > { %v350_v49 = vmul.f32 0.5, %v344_v48 }
 0x37d   : > { %v352_v50 = vadd.f32 1e-05, %v350_v49 }
 0x37f   : > { %808 = vrsqrt.f32 %v352_v50  ;;  %vm360_vm9 = vweird.f32 %v352_v50 }
 0x382   : > { %v347_v51 = vpop.f32.mrf.mxu0 }
 0x383   : > { %v351_v52 = vmul.f32 0.5, %v347_v51 }
 0x385   : > { %v809_v53 = vpop.eup %808  ;;  %v353_v54 = vadd.f32 1e-05, %v351_v52 }
 0x386   : > { %v355_v55 = vmul.f32 %v809_v53, %v352_v50  ;;  %vm361_vm8 = vweird.f32 %v809_v53 }
 0x387   : > { %810 = vrsqrt.f32 %v353_v54  ;;  %vm362_vm10 = vmor %vm360_vm9, %vm361_vm8  ;;  %vm370_vm12 = vweird.f32 %v353_v54 }
 0x388   : > { %v356_v57 = vmul.f32 %v809_v53, %v355_v55 }
 0x38a   : > { %v357_v58 = vmul.f32 0.5, %v356_v57 }
 0x38c   : > { %v358_v59 = vsub.f32 1.5, %v357_v58 }
 0x38d   : > { %v811_v60 = vpop.eup %810 }
 0x38e   : > { %v359_v62 = vmul.f32 %v809_v53, %v358_v59  ;;  %v365_v63 = vmul.f32 %v811_v60, %v353_v54  ;;  %vm371_vm11 = vweird.f32 %v811_v60 }
 0x38f   : > { %vm372_vm13 = vmor %vm370_vm12, %vm371_vm11 }
 0x390   : > { %v366_v0 = vmul.f32 %v811_v60, %v365_v63  ;;  %v363_v1 = vsel %vm362_vm10, %v809_v53, %v359_v62 }
 0x391   : > { %v374_v7 = vmul.f32 %v363_v1, %v317_v42 }
 0x392   : > { %v367_v5 = vmul.f32 0.5, %v366_v0 }
 0x393   : > { %v376_v12 = vmul.f32 %v374_v7, %v1162_v56 }
 0x394   : > { %v368_v6 = vsub.f32 1.5, %v367_v5 }
 0x395   : > { %v378_v30 = vadd.f32 %v376_v12, %v1166_v61 }
 0x396   : > { %v369_v8 = vmul.f32 %v811_v60, %v368_v6 }
 0x398   : > { %v373_v9 = vsel %vm372_vm13, %v811_v60, %v369_v8 }
 0x399   : > { %v375_v11 = vmul.f32 %v373_v9, %v318_v46 }
 0x39b   : > { %v377_v13 = vmul.f32 %v375_v11, %v1162_v56 }
 0x39d   : > { %v379_v33 = vadd.f32 %v377_v13, %v1166_v61 }
 0x39f   : > { %v380_v34 = vpack.c.bf16 %v379_v33, %v378_v30 }
 0x3a1   : > { %751 = vmatmul.msk.bf16.vlgmr.msrb.gmra.mxu1 %vm133_vm0, %v380_v34 }
 0x3a2   : > { %665 = vmatpush.bf16.msrb.mxu1 %v1056_v16 }
 0x3a6   : > { %666 = vmatpush.bf16.msrb.mxu1 %v1054_v15 }
 0x3aa   : > { %667 = vmatpush.bf16.msrb.mxu1 %v1052_v14 }
 0x3ae   : > { %668 = vmatpush.bf16.msrb.mxu1 %v1050_v10 }
 0x41e   : > { %v398_v38 = vpop.f32.mrf.mxu1 }
 0x41f   : > { %v399_v42 = vadd.f32 %v398_v38, %v1243_v40 }
 0x426   : > { %v400_v41 = vpop.f32.mrf.mxu1 }
 0x427   : > { %v401_v43 = vadd.f32 %v400_v41, %v1243_v40 }
 0x429   : > { %v403_v44 = vpack.c.bf16 %v401_v43, %v399_v42 }
 0x42b   : > { %411 = vmatpush.bf16.msrb.mxu2 %v403_v44 }
 0x42e   : > { %752 = vmatmul.msk.bf16.vlgmr.msrb.gmra.mxu2 %vm261_vm7, %v1048_v3 }
 0x4b1   : > { %v413_v45 = vpop.f32.mrf.mxu2 }
 0x4b2   : > { %v1250_v46 = vadd.f32 %v413_v45, %v1196_v29 }
 0x4b4   : > { %v418_v47 = vmax.f32 %v1250_v46, 0.0 }
 0x4b6   : > { %v420_v48 = vmul.f32 0.0625, %v418_v47 }
 0x4b8   : > { %v422_v49 = vadd.f32 %v966_v2, %v420_v48 }
 0x4b9   : > { %v415_v50 = vpop.f32.mrf.mxu2 }
 0x4ba   : > { %v1257_v51 = vadd.f32 %v415_v50, %v1196_v29  ;;  %753 = vmatmul.msk.f32.vlgmr.msra.gmra.mxu3 %vm133_vm0, %v422_v49 }
 0x4bb   : > { %765 = vmatpush.msra.mxu3 %v1092_v28 }
 0x4bc   : > { %v419_v52 = vmax.f32 %v1257_v51, 0.0 }
 0x4bd   : > { %766 = vmatpush.msra.mxu3 %v1090_v27 }
 0x4be   : > { %v421_v53 = vmul.f32 0.0625, %v419_v52 }
 0x4bf   : > { %767 = vmatpush.msra.mxu3 %v1088_v26 }
 0x4c0   : > { %v423_v54 = vadd.f32 %v962_v4, %v421_v53 }
 0x4c1   : > { %768 = vmatpush.msra.mxu3 %v1086_v25 }
 0x4c2   : > { %754 = vmatmul.msk.f32.gmra.mxu3 %vm133_vm0, %v423_v54 }
 0x4c3   : > { %769 = vmatpush.msra.mxu3 %v1084_v24 }
 0x4c5   : > { %770 = vmatpush.msra.mxu3 %v1082_v23 }
 0x4c7   : > { %771 = vmatpush.msra.mxu3 %v1080_v22 }
 0x4c9   : > { %772 = vmatpush.msra.mxu3 %v1078_v21 }
 0x53d   : > { %v447_v55 = vpop.f32.mrf.mxu3 }
 0x53e   : > { %v453_v57 = vmul.f32 0.5, %v447_v55 }
 0x540   : > { %v455_v58 = vsub.f32 %v422_v49, %v453_v57 }
 0x542   : > { %v457_v59 = vmul.f32 %v455_v58, %v455_v58 }
 0x544   : > { %755 = vmatmul.msk.f32.vlgmr.msra.gmra.mxu0 %vm133_vm0, %v457_v59 }
 0x545   : > { %v450_v60 = vpop.f32.mrf.mxu3 }
 0x546   : > { %v454_v62 = vmul.f32 0.5, %v450_v60 }
 0x548   : > { %v456_v63 = vsub.f32 %v423_v54, %v454_v62 }
 0x54a   : > { %v458_v0 = vmul.f32 %v456_v63, %v456_v63 }
 0x54c   : > { %756 = vmatmul.msk.f32.gmra.mxu0 %vm133_vm0, %v458_v0 }
 0x5c1   : > { %v482_v1 = vpop.f32.mrf.mxu0 }
 0x5c2   : > { %v488_v5 = vmul.f32 0.5, %v482_v1  ;;  %v692_v1 = vmul.f32 2.0, %v418_v47 }
 0x5c4   : > { %v490_v6 = vadd.f32 1e-05, %v488_v5 }
 0x5c6   : > { %812 = vrsqrt.f32 %v490_v6  ;;  %vm498_vm15 = vweird.f32 %v490_v6 }
 0x5c9   : > { %v485_v7 = vpop.f32.mrf.mxu0 }
 0x5ca   : > { %v489_v8 = vmul.f32 0.5, %v485_v7  ;;  %v694_v7 = vadd.f32 %v692_v1, %v279_v32 }
 0x5cc   : > { %v813_v9 = vpop.eup %812  ;;  %v491_v11 = vadd.f32 1e-05, %v489_v8 }
 0x5cd   : > { %v493_v12 = vmul.f32 %v813_v9, %v490_v6  ;;  %vm499_vm14 = vweird.f32 %v813_v9 }
 0x5ce   : > { %814 = vrsqrt.f32 %v491_v11  ;;  %vm500_vm1 = vmor %vm498_vm15, %vm499_vm14  ;;  %vm508_vm3 = vweird.f32 %v491_v11 }
 0x5cf   : > { %v494_v13 = vmul.f32 %v813_v9, %v493_v12 }
 0x5d1   : > { %v495_v30 = vmul.f32 0.5, %v494_v13  ;;  %v693_v13 = vmul.f32 2.0, %v419_v52 }
 0x5d3   : > { %v496_v33 = vsub.f32 1.5, %v495_v30  ;;  %v695_v47 = vadd.f32 %v693_v13, %v280_v37 }
 0x5d4   : > { %v815_v34 = vpop.eup %814 }
 0x5d5   : > { %v497_v35 = vmul.f32 %v813_v9, %v496_v33  ;;  %v503_v38 = vmul.f32 %v815_v34, %v491_v11  ;;  %vm509_vm2 = vweird.f32 %v815_v34 }
 0x5d6   : > { %vm510_vm4 = vmor %vm508_vm3, %vm509_vm2 }
 0x5d7   : > { %v504_v39 = vmul.f32 %v815_v34, %v503_v38  ;;  %v501_v41 = vsel %vm500_vm1, %v813_v9, %v497_v35 }
 0x5d8   : > { %v512_v44 = vmul.f32 %v501_v41, %v455_v58 }
 0x5d9   : > { %v505_v42 = vmul.f32 0.5, %v504_v39 }
 0x5da   : > { %v514_v49 = vmul.f32 %v512_v44, %v1162_v56 }
 0x5db   : > { %v506_v43 = vsub.f32 1.5, %v505_v42 }
 0x5dc   : > { %v516_v54 = vadd.f32 %v514_v49, %v1166_v61 }
 0x5dd   : > { %v507_v45 = vmul.f32 %v815_v34, %v506_v43 }
 0x5df   : > { %v511_v48 = vsel %vm510_vm4, %v815_v34, %v507_v45 }
 0x5e0   : > { %v513_v50 = vmul.f32 %v511_v48, %v456_v63 }
 0x5e2   : > { %v515_v53 = vmul.f32 %v513_v50, %v1162_v56 }
 0x5e4   : > { %v517_v55 = vadd.f32 %v515_v53, %v1166_v61 }
 0x5e6   : > { %v518_v57 = vpack.c.bf16 %v517_v55, %v516_v54 }
 0x5e8   : > { %757 = vmatmul.msk.bf16.vlgmr.msra.gmra.mxu1 %vm133_vm0, %v518_v57 }
 0x665   : > { %v531_v59 = vpop.f32.mrf.mxu1 }
 0x666   : > { %v532_v58 = vadd.f32 %v531_v59, %v1243_v40 }
 0x66d   : > { %v533_v60 = vpop.f32.mrf.mxu1 }
 0x66e   : > { %v534_v62 = vadd.f32 %v533_v60, %v1243_v40 }
 0x670   : > { %v536_v0 = vpack.c.bf16 %v534_v62, %v532_v58 }
 0x672   : > { %544 = vmatpush.bf16.msra.mxu2 %v536_v0 }
 0x675   : > { %758 = vmatmul.msk.bf16.vlgmr.msra.gmra.mxu2 %vm261_vm7, %v1048_v3 }
 0x6f8   : > { %v546_v63 = vpop.f32.mrf.mxu2 }
 0x6f9   : > { %v547_v5 = vadd.f32 %v546_v63, %v1196_v29 }
 0x6fb   : > { %v551_v6 = vmax.f32 %v547_v5, 0.0 }
 0x6fd   : > { %v554_v8 = vmul.f32 0.125, %v551_v6  ;;  %v696_v9 = vmul.f32 2.0, %v551_v6 }
 0x6ff   : > { %v556_v11 = vadd.f32 %v966_v2, %v554_v8  ;;  %v1290_v40 = vadd.f32 %v696_v9, %v694_v7 }
 0x700   : > { %v548_v12 = vpop.f32.mrf.mxu2 }
 0x701   : > { %v549_v30 = vadd.f32 %v548_v12, %v1196_v29  ;;  %759 = vmatmul.msk.f32.vlgmr.msrb.gmra.mxu3 %vm133_vm0, %v556_v11 }
 0x703   : > { %v552_v46 = vmax.f32 %v549_v30, 0.0 }
 0x705   : > { %v555_v31 = vmul.f32 0.125, %v552_v46  ;;  %v697_v32 = vmul.f32 2.0, %v552_v46  ;;  %v653_v46 = vstv %s553_s9 }
 0x707   : > { %v557_v33 = vadd.f32 %v962_v4, %v555_v31  ;;  %v1299_v34 = vadd.f32 %v697_v32, %v695_v47  ;;  %v654_v31 = vmul.f32 %v653_v46, %v1061_v17 }
 0x709   : > { %760 = vmatmul.msk.f32.gmra.mxu3 %vm133_vm0, %v557_v33  ;;  %v656_v32 = vperm.slane %v654_v31, 0 }
 0x784   : > { %v581_v35 = vpop.f32.mrf.mxu3 }
 0x785   : > { %v587_v38 = vmul.f32 0.5, %v581_v35 }
 0x787   : > { %v589_v51 = vsub.f32 %v556_v11, %v587_v38 }
 0x789   : > { %v591_v52 = vmul.f32 %v589_v51, %v589_v51 }
 0x78b   : > { %761 = vmatmul.msk.f32.vlgmr.msrb.gmra.mxu0 %vm133_vm0, %v591_v52 }
 0x78c   : > { %v584_v39 = vpop.f32.mrf.mxu3 }
 0x78d   : > { %v588_v41 = vmul.f32 0.5, %v584_v39 }
 0x78f   : > { %v590_v42 = vsub.f32 %v557_v33, %v588_v41 }
 0x791   : > { %v592_v43 = vmul.f32 %v590_v42, %v590_v42 }
 0x793   : > { %762 = vmatmul.msk.f32.vlgmr.msra.gmra.mxu3 %vm133_vm0, %v592_v43 }
 0x808   : > { %v616_v36 = vpop.f32.mrf.mxu0 }
 0x809   : > { %v622_v37 = vmul.f32 0.5, %v616_v36 }
 0x80b   : > { %v624_v44 = vadd.f32 1e-05, %v622_v37 }
 0x80d   : > { %816 = vrsqrt.f32 %v624_v44  ;;  %vm632_vm6 = vweird.f32 %v624_v44 }
 0x813   : > { %v817_v45 = vpop.eup %816 }
 0x814   : > { %v627_v48 = vmul.f32 %v817_v45, %v624_v44  ;;  %vm633_vm5 = vweird.f32 %v817_v45 }
 0x815   : > { %vm634_vm8 = vmor %vm632_vm6, %vm633_vm5 }
 0x816   : > { %v628_v49 = vmul.f32 %v817_v45, %v627_v48  ;;  %v619_v50 = vpop.f32.mrf.mxu3 }
 0x817   : > { %v623_v53 = vmul.f32 0.5, %v619_v50 }
 0x818   : > { %v629_v55 = vmul.f32 0.5, %v628_v49 }
 0x819   : > { %v625_v54 = vadd.f32 1e-05, %v623_v53 }
 0x81a   : > { %v630_v57 = vsub.f32 1.5, %v629_v55 }
 0x81b   : > { %818 = vrsqrt.f32 %v625_v54  ;;  %vm642_vm10 = vweird.f32 %v625_v54 }
 0x81c   : > { %v631_v60 = vmul.f32 %v817_v45, %v630_v57 }
 0x81e   : > { %v635_v0 = vsel %vm634_vm8, %v817_v45, %v631_v60 }
 0x81f   : > { %v646_v5 = vmul.f32 %v635_v0, %v589_v51 }
 0x821   : > { %v819_v59 = vpop.eup %818  ;;  %v648_v8 = vmul.f32 %v646_v5, %v1162_v56 }
 0x822   : > { %v637_v58 = vmul.f32 %v819_v59, %v625_v54  ;;  %vm643_vm9 = vweird.f32 %v819_v59 }
 0x823   : > { %vm644_vm11 = vmor %vm642_vm10, %vm643_vm9  ;;  %v650_v12 = vadd.f32 %v648_v8, %v1166_v61 }
 0x824   : > { %v638_v62 = vmul.f32 %v819_v59, %v637_v58 }
 0x826   : > { %v639_v63 = vmul.f32 0.5, %v638_v62 }
 0x828   : > { %v640_v1 = vsub.f32 1.5, %v639_v63 }
 0x82a   : > { %v641_v6 = vmul.f32 %v819_v59, %v640_v1 }
 0x82c   : > { %v645_v7 = vsel %vm644_vm11, %v819_v59, %v641_v6 }
 0x82d   : > { %v647_v9 = vmul.f32 %v645_v7, %v590_v42 }
 0x82f   : > { %v649_v11 = vmul.f32 %v647_v9, %v1162_v56 }
 0x831   : > { %v651_v13 = vadd.f32 %v649_v11, %v1166_v61 }
 0x833   : > { %v652_v30 = vpack.c.bf16 %v651_v13, %v650_v12 }
 0x835   : > { %763 = vmatmul.msk.bf16.vlgmr.msrb.gmra.mxu1 %vm133_vm0, %v652_v30 }
 0x8b2   : > { %v670_v47 = vpop.f32.mrf.mxu1 }
 0x8b3   : > { %v671_v35 = vadd.f32 %v670_v47, %v656_v32 }
 0x8ba   : > { %v672_v33 = vpop.f32.mrf.mxu1 }
 0x8bb   : > { %v673_v38 = vadd.f32 %v672_v33, %v656_v32 }
 0x8bd   : > { %v675_v51 = vpack.c.bf16 %v673_v38, %v671_v35 }
 0x8bf   : > { %683 = vmatpush.bf16.msrb.mxu2 %v675_v51 }
 0x8c2   : > { %764 = vmatmul.msk.bf16.vlgmr.msrb.gmra.mxu2 %vm261_vm7, %v1048_v3 }
 0x945   : > { %v685_v56 = vpop.f32.mrf.mxu2 }
 0x946   : > { %v686_v61 = vadd.f32 %v685_v56, %v1196_v29 }
 0x948   : > { %v690_v52 = vmax.f32 %v686_v61, 0.0 }
 0x94a   : > { %v700_v39 = vadd.f32 %v1290_v40, %v690_v52 }
 0x94c   : > { %v702_v41 = vmul.f32 0.020833334, %v700_v39 }
 0x94d   : > { %v687_v42 = vpop.f32.mrf.mxu2 }
 0x94e   : > { %v704_v43 = vadd.f32 %v966_v2, %v702_v41   ;;  %v688_v36 = vadd.f32 %v687_v42, %v1196_v29 }
 0x950   : > { %v691_v37 = vmax.f32 %v688_v36, 0.0  ;;  %v1344_v2 = vmov %v704_v43  ;;  %707 = vst.msk [vmem:[#allocation10] sm:$0xff] (%p125_p0), %vm133_vm0, %v704_v43 }
 0x952   : > { %v701_v44 = vadd.f32 %v1299_v34, %v691_v37 }
 0x954   : > { %v703_v45 = vmul.f32 0.020833334, %v701_v44  ;;  %127 = sbr.rel (!%p125_p0) target bundleno = 29 (0x1d), region = 75 }
 0x956   : > { %v705_v48 = vadd.f32 %v962_v4, %v703_v45  }
 0x958   : > { %v1343_v4 = vmov %v705_v48  ;;  %708 = vst.msk [vmem:[#allocation10 + $0x8] sm:$0xff] (%p125_p0), %vm133_vm0, %v705_v48 }
 0x959   :  { %721 = dma.vmem_to_hbm [thread:$0]  %s714_s16, 256, %s716_s12, [#allocation4], %s973_s13, %s973_s13, %s974_s14  }
 0x95a   :  { %958 = dma.done.wait [#allocation4], 256  }
 0x95b   :  { %959 = vsyncadd [#allocation4], 4294967040 }
 0x95c   :  { %726 = vsyncpa [#allocation3], 1 }
 0x95d   :  { %727 = vsyncpa [#allocation6], 1 }
 0x95e   :  { %728 = vsyncpa [#allocation9], 1 }
 0x95f   :  { %729 = vsyncpa [#allocation4], 1 }

</bundles_post_ra>
